<compile_context>
chip_gen: v5e
topology: v5e:2x2
jax: 0.10.0
libtpu: 0.0.40
codegen_flags: <defaults>
</compile_context>

<pallas_src>
import functools

import jax
import jax.numpy as jnp
from jax import lax
from jax.experimental import pallas as pl
from jax.experimental.pallas import tpu as pltpu


_VMEM_LIMIT = 32 * 1024 * 1024  # explicit scoped-VMEM budget (safe on v5e/v6e/v7x)


def _pick_tile(dim, target):
    """Largest legal tile: `target` if it evenly divides `dim`, else full dim."""
    if dim <= target:
        return dim
    if dim % target == 0:
        return target
    return dim


# ---------------------------------------------------------------------------
# Tiled linear kernel:  out = x @ w + b   (K-accumulation in VMEM scratch)
# ---------------------------------------------------------------------------
def _linear_kernel(x_ref, w_ref, b_ref, o_ref, acc_ref):
    k = pl.program_id(2)

    @pl.when(k == 0)
    def _():
        acc_ref[...] = jnp.zeros_like(acc_ref)

    acc_ref[...] += jnp.dot(x_ref[...], w_ref[...],
                            preferred_element_type=jnp.float32)

    @pl.when(k == pl.num_programs(2) - 1)
    def _():
        o_ref[...] = (acc_ref[...] + b_ref[...]).astype(o_ref.dtype)


def pallas_linear(x2d, w, b, *, tm=256, tn=256, tk=512):
    """x2d: (M, K), w: (K, N), b: (N,) -> (M, N), tiled + pipelined."""
    M, K = x2d.shape
    Kw, N = w.shape
    assert K == Kw
    tm = _pick_tile(M, tm)
    tn = _pick_tile(N, tn)
    tk = _pick_tile(K, tk)
    b2d = b.reshape(1, N)
    grid = (M // tm, N // tn, K // tk)
    cost = pl.CostEstimate(
        flops=2 * M * N * K,
        transcendentals=0,
        bytes_accessed=4 * (M * K + K * N + M * N + N),
    )
    return pl.pallas_call(
        _linear_kernel,
        out_shape=jax.ShapeDtypeStruct((M, N), x2d.dtype),
        grid=grid,
        in_specs=[
            pl.BlockSpec((tm, tk), lambda i, j, k: (i, k)),
            pl.BlockSpec((tk, tn), lambda i, j, k: (k, j)),
            pl.BlockSpec((1, tn), lambda i, j, k: (0, j)),
        ],
        out_specs=pl.BlockSpec((tm, tn), lambda i, j, k: (i, j)),
        scratch_shapes=[pltpu.VMEM((tm, tn), jnp.float32)],
        compiler_params=pltpu.CompilerParams(
            dimension_semantics=("parallel", "parallel", "arbitrary"),
            vmem_limit_bytes=_VMEM_LIMIT,
        ),
        cost_estimate=cost,
    )(x2d, w, b2d)


# ---------------------------------------------------------------------------
# Flash-style multi-head attention kernel.
#   grid = (B, S//tq, S//tkv), kv axis is "arbitrary" (online softmax).
#   Blocks keep all heads packed in the lane dim: q/k (t, H*d_k), v (t, H*d_v),
#   out (tq, H*d_v).  A static (unrolled) Python loop handles the per-head
#   matmuls; state lives in VMEM scratch shaped (H, tq, ...).
# ---------------------------------------------------------------------------
def _flash_mha_kernel(*refs, n_head, d_k, d_v, scale, has_bias):
    if has_bias:
        q_ref, k_ref, v_ref, bias_ref = refs[:4]
        o_ref, m_sc, l_sc, acc_sc = refs[4:]
    else:
        q_ref, k_ref, v_ref = refs[:3]
        o_ref, m_sc, l_sc, acc_sc = refs[3:]

    kv = pl.program_id(2)

    @pl.when(kv == 0)
    def _():
        m_sc[...] = jnp.full_like(m_sc, -jnp.inf)
        l_sc[...] = jnp.zeros_like(l_sc)
        acc_sc[...] = jnp.zeros_like(acc_sc)

    bias = bias_ref[...] if has_bias else None  # (tq, tkv) additive (-1e9 / 0)

    for h in range(n_head):  # static unroll over heads
        # scale folded into q: O(tq*d_k) multiplies instead of O(tq*tkv) divides
        qh = q_ref[:, h * d_k:(h + 1) * d_k] * scale        # (tq, d_k)
        kh = k_ref[:, h * d_k:(h + 1) * d_k]                # (tkv, d_k)
        vh = v_ref[:, h * d_v:(h + 1) * d_v]                # (tkv, d_v)

        # contract d_k against d_k directly -- no k.T materialization
        s = lax.dot_general(qh, kh, (((1,), (1,)), ((), ())),
                            preferred_element_type=jnp.float32)  # (tq, tkv)
        if has_bias:
            s = s + bias

        m_prev = m_sc[h]                                     # (tq, 1)
        m_new = jnp.maximum(m_prev, jnp.max(s, axis=-1, keepdims=True))
        alpha = jnp.exp(m_prev - m_new)
        p = jnp.exp(s - m_new)                               # (tq, tkv)
        l_sc[h] = alpha * l_sc[h] + jnp.sum(p, axis=-1, keepdims=True)
        acc_sc[h] = alpha * acc_sc[h] + lax.dot_general(
            p, vh, (((1,), (0,)), ((), ())),
            preferred_element_type=jnp.float32)              # (tq, d_v)
        m_sc[h] = m_new

    @pl.when(kv == pl.num_programs(2) - 1)
    def _():
        for h in range(n_head):
            inv_l = pl.reciprocal(l_sc[h], approx=False)
            o_ref[:, h * d_v:(h + 1) * d_v] = (acc_sc[h] * inv_l).astype(o_ref.dtype)
        # TODO(synk): attention dropout omitted (identity in eval mode).


# ---------------------------------------------------------------------------
# Full MultiHeadAttention forward (eval mode)
# ---------------------------------------------------------------------------
def multi_head_attention(q, k, v, params, n_head, d_k, d_v, mask=None,
                         *, bias=-1e9, tq=128, tkv=128):
    B, S, d_model = q.shape
    out_dtype = q.dtype
    hdk = n_head * d_k
    hdv = n_head * d_v

    if mask is not None and mask.ndim == 4:   # accept (B,1,S,S) too
        mask = mask[:, 0]

    self_attn = (q is k) and (k is v)

    if self_attn:
        # ---- fused QKV projection: one tiled matmul, activation read once ----
        w_qkv = jnp.concatenate([params["w_qs"], params["w_ks"], params["w_vs"]], axis=1)
        b_qkv = jnp.concatenate([params["b_qs"], params["b_ks"], params["b_vs"]], axis=0)
        qkv = pallas_linear(q.reshape(B * S, d_model), w_qkv, b_qkv)
        qkv = qkv.reshape(B, S, 2 * hdk + hdv)
        # When the q/k/v sections are lane-aligned, read them straight out of
        # the fused buffer inside the attention kernel (no HBM slice copies).
        direct = (hdk % 128 == 0) and (hdv % 128 == 0) and ((2 * hdk) % hdv == 0)
        if direct:
            v_off = (2 * hdk) // hdv
            q_arr = k_arr = v_arr = qkv
            q_map = lambda b, qi, ki: (b, qi, 0)
            k_map = lambda b, qi, ki: (b, ki, 1)
            v_map = lambda b, qi, ki, _o=v_off: (b, ki, _o)
        else:
            q_arr = qkv[..., :hdk]
            k_arr = qkv[..., hdk:2 * hdk]
            v_arr = qkv[..., 2 * hdk:]
            q_map = lambda b, qi, ki: (b, qi, 0)
            k_map = lambda b, qi, ki: (b, ki, 0)
            v_map = lambda b, qi, ki: (b, ki, 0)
    else:
        # cross-attention: separate projections (weights differ per input)
        q_arr = pallas_linear(q.reshape(B * S, d_model),
                              params["w_qs"], params["b_qs"]).reshape(B, S, hdk)
        k_arr = pallas_linear(k.reshape(B * S, d_model),
                              params["w_ks"], params["b_ks"]).reshape(B, S, hdk)
        v_arr = pallas_linear(v.reshape(B * S, d_model),
                              params["w_vs"], params["b_vs"]).reshape(B, S, hdv)
        q_map = lambda b, qi, ki: (b, qi, 0)
        k_map = lambda b, qi, ki: (b, ki, 0)
        v_map = lambda b, qi, ki: (b, ki, 0)

    tq_ = _pick_tile(S, tq)
    tkv_ = _pick_tile(S, tkv)
    n_q = S // tq_
    n_kv = S // tkv_

    in_specs = [
        pl.BlockSpec((None, tq_, hdk), q_map),
        pl.BlockSpec((None, tkv_, hdk), k_map),
        pl.BlockSpec((None, tkv_, hdv), v_map),
    ]
    inputs = [q_arr, k_arr, v_arr]

    has_bias = mask is not None
    if has_bias:
        # additive bias precomputed once: one add per score instead of cmp+select
        mask_bias = jnp.where(mask == 0, jnp.float32(bias), jnp.float32(0.0))
        in_specs.append(pl.BlockSpec((None, tq_, tkv_), lambda b, qi, ki: (b, qi, ki)))
        inputs.append(mask_bias)

    scale = 1.0 / (float(d_k) ** 0.5)
    kernel = functools.partial(_flash_mha_kernel, n_head=n_head, d_k=d_k,
                               d_v=d_v, scale=scale, has_bias=has_bias)
    cost = pl.CostEstimate(
        flops=2 * B * n_head * S * S * (d_k + d_v),
        transcendentals=B * n_head * S * S,
        bytes_accessed=4 * (B * S * (2 * hdk + 2 * hdv)
                            + (B * S * S if has_bias else 0)),
    )

    attn_out = pl.pallas_call(
        kernel,
        out_shape=jax.ShapeDtypeStruct((B, S, hdv), out_dtype),
        grid=(B, n_q, n_kv),
        in_specs=in_specs,
        out_specs=pl.BlockSpec((None, tq_, hdv), lambda b, qi, ki: (b, qi, 0)),
        scratch_shapes=[
            pltpu.VMEM((n_head, tq_, 1), jnp.float32),     # running max m
            pltpu.VMEM((n_head, tq_, 1), jnp.float32),     # running sum l
            pltpu.VMEM((n_head, tq_, d_v), jnp.float32),   # output accumulator
        ],
        compiler_params=pltpu.CompilerParams(
            dimension_semantics=("parallel", "parallel", "arbitrary"),
            vmem_limit_bytes=_VMEM_LIMIT,
        ),
        cost_estimate=cost,
    )(*inputs)

    # attention output is already (B, S, H*d_v): feed the fc projection with a
    # free reshape -- no transpose round trip through HBM.
    out = pallas_linear(attn_out.reshape(B * S, hdv), params["w_fc"], params["b_fc"])
    # TODO(synk): output dropout omitted (identity in eval mode).
    return out.reshape(B, S, d_model)


# ---------------------------------------------------------------------------
# Parameter init (deterministic, PyTorch nn.Linear-style uniform bounds)
# ---------------------------------------------------------------------------
def init_params(key, n_head, d_model, d_k, d_v):
    def linear_init(key, fan_in, fan_out):
        kw, kb = jax.random.split(key)
        bound = 1.0 / (fan_in ** 0.5)
        w = jax.random.uniform(kw, (fan_in, fan_out), jnp.float32, -bound, bound)
        b = jax.random.uniform(kb, (fan_out,), jnp.float32, -bound, bound)
        return w, b

    k1, k2, k3, k4 = jax.random.split(key, 4)
    w_qs, b_qs = linear_init(k1, d_model, n_head * d_k)
    w_ks, b_ks = linear_init(k2, d_model, n_head * d_k)
    w_vs, b_vs = linear_init(k3, d_model, n_head * d_v)
    w_fc, b_fc = linear_init(k4, n_head * d_v, d_model)
    return dict(w_qs=w_qs, b_qs=b_qs, w_ks=w_ks, b_ks=b_ks,
                w_vs=w_vs, b_vs=b_vs, w_fc=w_fc, b_fc=b_fc)


# ---------------------------------------------------------------------------
# Reference (pure JAX, f32-exact matmuls) for a sanity check
# ---------------------------------------------------------------------------
def reference_mha(q, k, v, params, n_head, d_k, d_v, mask=None):
    with jax.default_matmul_precision("float32"):
        B, S, d_model = q.shape
        qh = (q @ params["w_qs"] + params["b_qs"]).reshape(B, S, n_head, d_k).transpose(0, 2, 1, 3)
        kh = (k @ params["w_ks"] + params["b_ks"]).reshape(B, S, n_head, d_k).transpose(0, 2, 1, 3)
        vh = (v @ params["w_vs"] + params["b_vs"]).reshape(B, S, n_head, d_v).transpose(0, 2, 1, 3)
        scores = jnp.einsum("bhqd,bhkd->bhqk", qh, kh) / (d_k ** 0.5)
        if mask is not None:
            scores = jnp.where(mask[:, None] == 0, -1e9, scores)
        atten = jax.nn.softmax(scores, axis=-1)
        out = jnp.einsum("bhqk,bhkd->bhqd", atten, vh)
        out = out.transpose(0, 2, 1, 3).reshape(B, S, n_head * d_v)
        return out @ params["w_fc"] + params["b_fc"]


# ---------------------------------------------------------------------------
if __name__ == "__main__":
    batch, seq, d_model = 2, 8, 128
    n_head, d_k, d_v = 4, 32, 32

    root = jax.random.PRNGKey(0)
    kp, kx, kq, kk, kv = jax.random.split(root, 5)
    params = init_params(kp, n_head, d_model, d_k, d_v)

    # --- self-attention (fused QKV projection path), no mask ---
    x = jax.random.normal(kx, (batch, seq, d_model), jnp.float32)
    out = multi_head_attention(x, x, x, params, n_head, d_k, d_v, mask=None)
    out = jax.block_until_ready(out)
    ref = reference_mha(x, x, x, params, n_head, d_k, d_v, mask=None)
    assert out.shape == (batch, seq, d_model)
    assert jnp.allclose(out, ref, atol=1e-3, rtol=1e-3)

    # --- self-attention with a causal mask (additive-bias path) ---
    causal = jnp.broadcast_to(jnp.tril(jnp.ones((seq, seq), jnp.int32)),
                              (batch, seq, seq))
    out_m = multi_head_attention(x, x, x, params, n_head, d_k, d_v, mask=causal)
    out_m = jax.block_until_ready(out_m)
    ref_m = reference_mha(x, x, x, params, n_head, d_k, d_v, mask=causal)
    assert jnp.allclose(out_m, ref_m, atol=1e-3, rtol=1e-3)

    # --- cross-attention (separate projection path), no mask ---
    qx = jax.random.normal(kq, (batch, seq, d_model), jnp.float32)
    kxx = jax.random.normal(kk, (batch, seq, d_model), jnp.float32)
    vx = jax.random.normal(kv, (batch, seq, d_model), jnp.float32)
    out_c = multi_head_attention(qx, kxx, vx, params, n_head, d_k, d_v, mask=None)
    out_c = jax.block_until_ready(out_c)
    ref_c = reference_mha(qx, kxx, vx, params, n_head, d_k, d_v, mask=None)
    assert jnp.allclose(out_c, ref_c, atol=1e-3, rtol=1e-3)

    print("KERNEL_OK")
</pallas_src>

<mosaic_0001>
module attributes {stable_mosaic.version = 11 : i64} {
  func.func @_linear_kernel(%arg0: i32, %arg1: i32, %arg2: i32, %arg3: memref<16x128xf32, #tpu.memory_space<vmem>>, %arg4: memref<128x384xf32, #tpu.memory_space<vmem>>, %arg5: memref<1x384xf32, #tpu.memory_space<vmem>>, %arg6: memref<16x384xf32, #tpu.memory_space<vmem>>, %arg7: memref<16x384xf32, #tpu.memory_space<vmem>>) attributes {dimension_semantics = [#tpu.dimension_semantics<parallel>, #tpu.dimension_semantics<parallel>, #tpu.dimension_semantics<arbitrary>], iteration_bounds = array<i64: 1, 1, 1>, scalar_prefetch = 0 : i64, scratch_operands = 1 : i64, tpu.core_type = #tpu.core_type<tc>, window_params = [{transform_indices = @transform_0, window_bounds = array<i64: 16, 128>}, {transform_indices = @transform_1, window_bounds = array<i64: 128, 384>}, {transform_indices = @transform_2, window_bounds = array<i64: 1, 384>}, {transform_indices = @transform_3, window_bounds = array<i64: 16, 384>}]} {
    %c0_i32 = arith.constant 0 : i32
    %0 = arith.cmpi eq, %arg2, %c0_i32 : i32
    %1 = arith.extui %0 : i1 to i32
    %c0_i32_0 = arith.constant 0 : i32
    %2 = arith.cmpi ne, %1, %c0_i32_0 : i32
    scf.if %2 {
      %cst_10 = arith.constant 0.000000e+00 : f32
      %12 = vector.broadcast %cst_10 : f32 to vector<16x384xf32>
      %c0_11 = arith.constant 0 : index
      %c0_12 = arith.constant 0 : index
      %13 = vector.load %arg7[%c0_11, %c0_12] : memref<16x384xf32, #tpu.memory_space<vmem>>, vector<16x384xf32>
      tpu.vector_store %arg7[%c0_11, %c0_12], %12 {strides = array<i32>} : memref<16x384xf32, #tpu.memory_space<vmem>>, vector<16x384xf32>,
    } else {
    }
    %c0 = arith.constant 0 : index
    %c0_1 = arith.constant 0 : index
    %3 = vector.load %arg7[%c0, %c0_1] : memref<16x384xf32, #tpu.memory_space<vmem>>, vector<16x384xf32>
    %c0_2 = arith.constant 0 : index
    %c0_3 = arith.constant 0 : index
    %4 = vector.load %arg3[%c0_2, %c0_3] : memref<16x128xf32, #tpu.memory_space<vmem>>, vector<16x128xf32>
    %c0_4 = arith.constant 0 : index
    %c0_5 = arith.constant 0 : index
    %5 = vector.load %arg4[%c0_4, %c0_5] : memref<128x384xf32, #tpu.memory_space<vmem>>, vector<128x384xf32>
    %cst = arith.constant dense<0.000000e+00> : vector<16x384xf32>
    %6 = tpu.matmul %4, %5, %cst {dimension_numbers = #tpu.dot_dimension_numbers<[1], [0], [0], [1], [0, 0, 1, 1], [], []>} : vector<16x128xf32>, vector<128x384xf32>, vector<16x384xf32> -> vector<16x384xf32>
    %7 = arith.addf %3, %6 : vector<16x384xf32>
    %c0_6 = arith.constant 0 : index
    %c0_7 = arith.constant 0 : index
    %8 = vector.load %arg7[%c0_6, %c0_7] : memref<16x384xf32, #tpu.memory_space<vmem>>, vector<16x384xf32>
    tpu.vector_store %arg7[%c0_6, %c0_7], %7 {strides = array<i32>} : memref<16x384xf32, #tpu.memory_space<vmem>>, vector<16x384xf32>,
    %c0_i32_8 = arith.constant 0 : i32
    %9 = arith.cmpi eq, %arg2, %c0_i32_8 : i32
    %10 = arith.extui %9 : i1 to i32
    %c0_i32_9 = arith.constant 0 : i32
    %11 = arith.cmpi ne, %10, %c0_i32_9 : i32
    scf.if %11 {
      %c0_10 = arith.constant 0 : index
      %c0_11 = arith.constant 0 : index
      %12 = vector.load %arg7[%c0_10, %c0_11] : memref<16x384xf32, #tpu.memory_space<vmem>>, vector<16x384xf32>
      %c0_12 = arith.constant 0 : index
      %c0_13 = arith.constant 0 : index
      %13 = vector.load %arg5[%c0_12, %c0_13] : memref<1x384xf32, #tpu.memory_space<vmem>>, vector<1x384xf32>
      %14 = vector.broadcast %13 : vector<1x384xf32> to vector<16x384xf32>
      %15 = arith.addf %12, %14 : vector<16x384xf32>
      %c0_14 = arith.constant 0 : index
      %c0_15 = arith.constant 0 : index
      %16 = vector.load %arg6[%c0_14, %c0_15] : memref<16x384xf32, #tpu.memory_space<vmem>>, vector<16x384xf32>
      tpu.vector_store %arg6[%c0_14, %c0_15], %15 {strides = array<i32>} : memref<16x384xf32, #tpu.memory_space<vmem>>, vector<16x384xf32>,
    } else {
    }
    return
  }
  func.func @transform_0(%arg0: i32, %arg1: i32, %arg2: i32) -> (i32, i32) {
    %c0_i32 = arith.constant 0 : i32
    return %arg0, %arg2 : i32, i32
  }
  func.func @transform_1(%arg0: i32, %arg1: i32, %arg2: i32) -> (i32, i32) {
    %c0_i32 = arith.constant 0 : i32
    return %arg2, %arg1 : i32, i32
  }
  func.func @transform_2(%arg0: i32, %arg1: i32, %arg2: i32) -> (i32, i32) {
    %c0_i32 = arith.constant 0 : i32
    %c0_i32_0 = arith.constant 0 : i32
    return %c0_i32, %arg1 : i32, i32
  }
  func.func @transform_3(%arg0: i32, %arg1: i32, %arg2: i32) -> (i32, i32) {
    %c0_i32 = arith.constant 0 : i32
    return %arg0, %arg1 : i32, i32
  }
}

</mosaic_0001>

<bundles_post_ra>
// kernel: tpu_custom_call.1
= control target key start
LH: loop header
LB: loop body
LE: loop exit
PB: predicated region body
PF: predicated region fallthrough
CT: control target
= control target key end

     0   :  { %8 = vsyncpa [#allocation4], 0  ;;  %s428_s0 = inlined_call_operand.hbm [shape: f32[16,128], index: 0, kind: input, shape index: {}]   ;;  %s429_s1 = inlined_call_operand.hbm [shape: f32[128,384], index: 1, kind: input, shape index: {}]   ;;  %s430_s2 = inlined_call_operand.hbm [shape: f32[1,384], index: 2, kind: input, shape index: {}]   ;;  %s431_s3 = inlined_call_operand.hbm [shape: f32[16,384], index: 3, kind: output, shape index: {}]  }
   0x1   :  { %9 = vsyncpa [#allocation7], 0  ;;  %s28_s14 = sshll.u32 %s429_s1, 4  ;;  %s29_s14 = int_to_ptr.hbm [resolvable:$true] %s28_s14 }
   0x2   :  { %10 = vsyncpa [#allocation5], 0  ;;  %s382_s15 = smov [#allocation6]   ;;  %s15_s19 = sshll.u32 %s428_s0, 4  ;;  %s16_s19 = int_to_ptr.hbm [resolvable:$true] %s15_s19 }
   0x3   :  { %s30_s16 = sshll.u32 %s382_s15, 4  ;;  %s383_s20 = smov 384   ;;  %s31_s16 = int_to_ptr.vmem [resolvable:$true] %s30_s16 }
   0x4   :  { %s384_s21 = smov 24   ;;  %s385_s22 = smov [#allocation3]  }
   0x5   :  { %36 = dma.hbm_to_vmem [thread:$0]  %s29_s14, 6144, %s31_s16, [#allocation7], %s383_s20, %s383_s20, %s384_s21  }
   0x6   :  { %s17_s23 = sshll.u32 %s385_s22, 4  ;;  %s386_s1 = smov 128   ;;  %s18_s23 = int_to_ptr.vmem [resolvable:$true] %s17_s23 }
   0x7   :  { %s387_s24 = smov 8   ;;  %s42_s27 = sshll.u32 %s430_s2, 4  ;;  %s43_s27 = int_to_ptr.hbm [resolvable:$true] %s42_s27 }
   0x8   :  { %23 = dma.hbm_to_vmem [thread:$0]  %s16_s19, 256, %s18_s23, [#allocation4], %s386_s1, %s386_s1, %s387_s24  }
   0x9   :  { %s388_s28 = smov [#allocation8]  }
   0xa   :  { %s44_s0 = sshll.u32 %s388_s28, 4  ;;  %s45_s0 = int_to_ptr.vmem [resolvable:$true] %s44_s0 }
   0xb   :  { %47 = dma.hbm_to_vmem [thread:$0]  %s43_s27, 48, %s45_s0, [#allocation7]  }
   0xc   :  { %376 = dma.done.wait [#allocation4], 256  }
   0xd   :  { %377 = vsyncadd [#allocation4], 4294967040 }
   0xe   :  { %378 = dma.done.wait [#allocation7], 6192  }
   0xf   :  { %379 = vsyncadd [#allocation7], 4294961104  ;;  %v125_v0 = vld [vmem:[#allocation6 + $0x178] sm:$0xff]  ;;  %v122_v1 = vld [vmem:[#allocation6 + $0x160] sm:$0xff]  ;;  %s389_s2 = smov [#allocation9]   ;;  %s242_s5 = sshll.u32 %s431_s3, 4  ;;  %s243_s5 = int_to_ptr.hbm [resolvable:$true] %s242_s5 }
  0x10   :  { %172 = vmatpush.msra.mxu2 %v125_v0  ;;  %v124_v2 = vld [vmem:[#allocation6 + $0x170] sm:$0xff]  ;;  %v123_v3 = vld [vmem:[#allocation6 + $0x168] sm:$0xff]  ;;  %v121_v5 = vld [vmem:[#allocation6 + $0x158] sm:$0xff]  ;;  %s240_s29 = sshll.u32 %s389_s2, 4  ;;  %s241_s29 = int_to_ptr.vmem [resolvable:$true] %s240_s29 }
  0x11   :  { %v119_v4 = vld [vmem:[#allocation6 + $0x148] sm:$0xff]  ;;  %149 = vmatpush.msra.mxu1 %v124_v2  ;;  %256 = vmatpush.msra.mxu3 %v123_v3  ;;  %v120_v6 = vld [vmem:[#allocation6 + $0x150] sm:$0xff]  ;;  %v118_v7 = vld [vmem:[#allocation6 + $0x140] sm:$0xff] }
  0x12   :  { %173 = vmatpush.msra.mxu2 %v122_v1  ;;  %v117_v8 = vld [vmem:[#allocation6 + $0x138] sm:$0xff]  ;;  %126 = vmatpush.msra.mxu0 %v123_v3  ;;  %v116_v9 = vld [vmem:[#allocation6 + $0x130] sm:$0xff]  ;;  %v115_v10 = vld [vmem:[#allocation6 + $0x128] sm:$0xff] }
  0x13   :  { %150 = vmatpush.msra.mxu1 %v121_v5  ;;  %257 = vmatpush.msra.mxu3 %v120_v6  ;;  %v114_v11 = vld [vmem:[#allocation6 + $0x120] sm:$0xff]  ;;  %v113_v12 = vld [vmem:[#allocation6 + $0x118] sm:$0xff]  ;;  %v112_v13 = vld [vmem:[#allocation6 + $0x110] sm:$0xff] }
  0x14   :  { %174 = vmatpush.msra.mxu2 %v119_v4  ;;  %127 = vmatpush.msra.mxu0 %v120_v6  ;;  %v111_v14 = vld [vmem:[#allocation6 + $0x108] sm:$0xff]  ;;  %v110_v15 = vld [vmem:[#allocation6 + $0x100] sm:$0xff]  ;;  %v109_v16 = vld [vmem:[#allocation6 + $0xf8] sm:$0xff] }
  0x15   :  { %151 = vmatpush.msra.mxu1 %v118_v7  ;;  %258 = vmatpush.msra.mxu3 %v117_v8  ;;  %v108_v17 = vld [vmem:[#allocation6 + $0xf0] sm:$0xff]  ;;  %v107_v18 = vld [vmem:[#allocation6 + $0xe8] sm:$0xff]  ;;  %v106_v19 = vld [vmem:[#allocation6 + $0xe0] sm:$0xff] }
  0x16   :  { %175 = vmatpush.msra.mxu2 %v116_v9  ;;  %128 = vmatpush.msra.mxu0 %v117_v8  ;;  %v105_v20 = vld [vmem:[#allocation6 + $0xd8] sm:$0xff]  ;;  %v104_v21 = vld [vmem:[#allocation6 + $0xd0] sm:$0xff]  ;;  %v103_v22 = vld [vmem:[#allocation6 + $0xc8] sm:$0xff] }
  0x17   :  { %152 = vmatpush.msra.mxu1 %v115_v10  ;;  %259 = vmatpush.msra.mxu3 %v114_v11  ;;  %v102_v23 = vld [vmem:[#allocation6 + $0xc0] sm:$0xff]  ;;  %v101_v24 = vld [vmem:[#allocation6 + $0xb8] sm:$0xff]  ;;  %v100_v25 = vld [vmem:[#allocation6 + $0xb0] sm:$0xff] }
  0x18   :  { %176 = vmatpush.msra.mxu2 %v113_v12  ;;  %129 = vmatpush.msra.mxu0 %v114_v11  ;;  %v99_v26 = vld [vmem:[#allocation6 + $0xa8] sm:$0xff]  ;;  %v98_v27 = vld [vmem:[#allocation6 + $0xa0] sm:$0xff]  ;;  %v97_v28 = vld [vmem:[#allocation6 + $0x98] sm:$0xff] }
  0x19   :  { %153 = vmatpush.msra.mxu1 %v112_v13  ;;  %260 = vmatpush.msra.mxu3 %v111_v14  ;;  %v96_v29 = vld [vmem:[#allocation6 + $0x90] sm:$0xff]  ;;  %v95_v30 = vld [vmem:[#allocation6 + $0x88] sm:$0xff]  ;;  %v94_v31 = vld [vmem:[#allocation6 + $0x80] sm:$0xff] }
  0x1a   :  { %177 = vmatpush.msra.mxu2 %v110_v15  ;;  %130 = vmatpush.msra.mxu0 %v111_v14  ;;  %v93_v32 = vld [vmem:[#allocation6 + $0x78] sm:$0xff]  ;;  %v92_v33 = vld [vmem:[#allocation6 + $0x70] sm:$0xff]  ;;  %v91_v34 = vld [vmem:[#allocation6 + $0x68] sm:$0xff] }
  0x1b   :  { %154 = vmatpush.msra.mxu1 %v109_v16  ;;  %261 = vmatpush.msra.mxu3 %v108_v17  ;;  %v90_v35 = vld [vmem:[#allocation6 + $0x60] sm:$0xff]  ;;  %v89_v36 = vld [vmem:[#allocation6 + $0x58] sm:$0xff]  ;;  %v88_v37 = vld [vmem:[#allocation6 + $0x50] sm:$0xff] }
  0x1c   :  { %178 = vmatpush.msra.mxu2 %v107_v18  ;;  %131 = vmatpush.msra.mxu0 %v108_v17  ;;  %v87_v38 = vld [vmem:[#allocation6 + $0x48] sm:$0xff]  ;;  %v86_v39 = vld [vmem:[#allocation6 + $0x40] sm:$0xff]  ;;  %v85_v40 = vld [vmem:[#allocation6 + $0x38] sm:$0xff] }
  0x1d   :  { %155 = vmatpush.msra.mxu1 %v106_v19  ;;  %262 = vmatpush.msra.mxu3 %v105_v20  ;;  %v84_v41 = vld [vmem:[#allocation6 + $0x30] sm:$0xff]  ;;  %v83_v42 = vld [vmem:[#allocation6 + $0x28] sm:$0xff]  ;;  %v82_v43 = vld [vmem:[#allocation6 + $0x20] sm:$0xff] }
  0x1e   :  { %179 = vmatpush.msra.mxu2 %v104_v21  ;;  %132 = vmatpush.msra.mxu0 %v105_v20  ;;  %v81_v44 = vld [vmem:[#allocation6 + $0x18] sm:$0xff]  ;;  %v80_v45 = vld [vmem:[#allocation6 + $0x10] sm:$0xff]  ;;  %v79_v47 = vld [vmem:[#allocation6 + $0x8] sm:$0xff] }
  0x1f   :  { %156 = vmatpush.msra.mxu1 %v103_v22  ;;  %263 = vmatpush.msra.mxu3 %v102_v23  ;;  %v76_v46 = vld [vmem:[#allocation3] sm:$0xff]  ;;  %v78_v48 = vld [vmem:[#allocation6] sm:$0xff]  ;;  %v77_v49 = vld [vmem:[#allocation3 + $0x8] sm:$0xff] }
  0x20   :  { %180 = vmatpush.msra.mxu2 %v101_v24  ;;  %133 = vmatpush.msra.mxu0 %v102_v23  ;;  %v216_v50 = vld [vmem:[#allocation8] sm:$0x7] }
  0x21   :  { %157 = vmatpush.msra.mxu1 %v100_v25  ;;  %264 = vmatpush.msra.mxu3 %v99_v26  ;;  %v219_v51 = vperm.slane %v216_v50, 1  ;;  %v218_v52 = vperm.slane %v216_v50, 0  ;;  %v220_v55 = vperm.slane %v216_v50, 2 }
  0x22   :  { %181 = vmatpush.msra.mxu2 %v98_v27  ;;  %134 = vmatpush.msra.mxu0 %v99_v26 }
  0x23   :  { %158 = vmatpush.msra.mxu1 %v97_v28  ;;  %265 = vmatpush.msra.mxu3 %v96_v29 }
  0x24   :  { %182 = vmatpush.msra.mxu2 %v95_v30  ;;  %135 = vmatpush.msra.mxu0 %v96_v29 }
  0x25   :  { %159 = vmatpush.msra.mxu1 %v94_v31  ;;  %266 = vmatpush.msra.mxu3 %v93_v32 }
  0x26   :  { %183 = vmatpush.msra.mxu2 %v92_v33  ;;  %136 = vmatpush.msra.mxu0 %v93_v32 }
  0x27   :  { %160 = vmatpush.msra.mxu1 %v91_v34  ;;  %267 = vmatpush.msra.mxu3 %v90_v35 }
  0x28   :  { %184 = vmatpush.msra.mxu2 %v89_v36  ;;  %137 = vmatpush.msra.mxu0 %v90_v35 }
  0x29   :  { %161 = vmatpush.msra.mxu1 %v88_v37  ;;  %268 = vmatpush.msra.mxu3 %v87_v38 }
  0x2a   :  { %185 = vmatpush.msra.mxu2 %v86_v39  ;;  %138 = vmatpush.msra.mxu0 %v87_v38 }
  0x2b   :  { %162 = vmatpush.msra.mxu1 %v85_v40  ;;  %269 = vmatpush.msra.mxu3 %v84_v41 }
  0x2c   :  { %186 = vmatpush.msra.mxu2 %v83_v42  ;;  %139 = vmatpush.msra.mxu0 %v84_v41 }
  0x2d   :  { %163 = vmatpush.msra.mxu1 %v82_v43  ;;  %270 = vmatpush.msra.mxu3 %v81_v44 }
  0x2e   :  { %187 = vmatpush.msra.mxu2 %v80_v45  ;;  %140 = vmatpush.msra.mxu0 %v81_v44 }
  0x2f   :  { %188 = vmatmul.f32.vlgmr.msra.gmra.mxu2 %v76_v46  ;;  %164 = vmatpush.msra.mxu1 %v79_v47 }
  0x30   :  { %165 = vmatmul.f32.vlgmr.msra.gmra.mxu1 %v76_v46  ;;  %271 = vmatpush.msra.mxu3 %v78_v48 }
  0x31   :  { %145 = vmatmul.f32.vlgmr.msra.gmra.mxu3 %v77_v49  ;;  %141 = vmatpush.msra.mxu0 %v78_v48 }
  0x32   :  { %142 = vmatmul.f32.vlgmr.msra.gmra.mxu0 %v76_v46 }
  0x37   :  { %191 = vmatmul.f32.gmra.mxu2 %v77_v49 }
  0x38   :  { %168 = vmatmul.f32.gmra.mxu1 %v77_v49 }
  0xad   :  { %v166_v53 = vpop.f32.mrf.mxu1 }
  0xae   :  { %v225_v54 = vadd.f32 %v219_v51, %v166_v53 }
  0xaf   :  { %v143_v56 = vpop.f32.mrf.mxu0 }
  0xb0   :  { %231 = vst [vmem:[#allocation9 + $0x8] sm:$0xff] %v225_v54  ;;  %v224_v57 = vadd.f32 %v218_v52, %v143_v56 }
  0xb2   :  { %v189_v58 = vpop.f32.mrf.mxu2  ;;  %230 = vst [vmem:[#allocation9] sm:$0xff] %v224_v57 }
  0xb3   :  { %v226_v59 = vadd.f32 %v220_v55, %v189_v58 }
  0xb4   :  { %v146_v60 = vpop.f32.mrf.mxu3 }
  0xb5   :  { %232 = vst [vmem:[#allocation9 + $0x10] sm:$0xff] %v226_v59  ;;  %v227_v61 = vadd.f32 %v218_v52, %v146_v60  ;;  %v169_v62 = vpop.f32.mrf.mxu1 }
  0xb6   :  { %v228_v63 = vadd.f32 %v219_v51, %v169_v62 }
  0xb7   :  { %233 = vst [vmem:[#allocation9 + $0x18] sm:$0xff] %v227_v61 }
  0xb8   :  { %234 = vst [vmem:[#allocation9 + $0x20] sm:$0xff] %v228_v63 }
  0xba   :  { %v192_v0 = vpop.f32.mrf.mxu2 }
  0xbb   :  { %v229_v1 = vadd.f32 %v220_v55, %v192_v0 }
  0xbd   :  { %235 = vst [vmem:[#allocation9 + $0x28] sm:$0xff] %v229_v1 }
  0xbe   :  { %248 = dma.vmem_to_hbm [thread:$0]  %s241_s29, 768, %s243_s5, [#allocation5], %s383_s20, %s383_s20, %s384_s21  }
  0xbf   :  { %380 = dma.done.wait [#allocation5], 768  }
  0xc0   :  { %381 = vsyncadd [#allocation5], 4294966528 }
  0xc1   :  { %253 = vsyncpa [#allocation4], 1 }
  0xc2   :  { %254 = vsyncpa [#allocation7], 1 }
  0xc3   :  { %255 = vsyncpa [#allocation5], 1 }

</bundles_post_ra>
